<compile_context>
chip_gen: v7x
topology: tpu7x:2x2x1
jax: 0.10.0
libtpu: 0.0.40
codegen_flags: <defaults>
</compile_context>

<pallas_src>
import functools

import jax
import jax.numpy as jnp
from jax.experimental import pallas as pl
from jax.experimental.pallas import tpu as pltpu

_LANE = 128            # vreg lane width
_SUBLANE = 8           # f32 sublane count
_BIAS_ROWS = _SUBLANE  # rows appended to each packed weight block (row d_in = bias)


def _round_up(x, m):
    return ((x + m - 1) // m) * m


def mlp_kernel(x_ref, wb1_ref, wb2_ref, wb3_ref, wb4_ref, wb5_ref, o_ref, *,
               mxu_dtype):
    """5-layer MLP forward for one batch tile, entirely in VMEM.

    Each wb ref packs one layer: rows [0, d_in) hold W ([in, out]) and row d_in
    holds the bias.  Hidden layers: h = relu(h @ W + b); final layer: no ReLU.
    """
    h = x_ref[...]
    wbs = (wb1_ref, wb2_ref, wb3_ref, wb4_ref, wb5_ref)
    for li, wb_ref in enumerate(wbs):          # static Python loop -> unrolled
        d_in = wb_ref.shape[0] - _BIAS_ROWS    # static, sublane/lane aligned
        w = wb_ref[0:d_in, :]
        b = wb_ref[d_in:d_in + 1, :]
        h = jnp.dot(h.astype(mxu_dtype), w.astype(mxu_dtype),
                    preferred_element_type=jnp.float32)
        h = h + b.astype(jnp.float32)          # f32 elementwise path (v5e-safe)
        if li != len(wbs) - 1:
            h = jnp.maximum(h, 0.0)
    o_ref[...] = h.astype(o_ref.dtype)


def _pack_layer(w, b, mxu_dtype):
    """Zero-pad W to (in_p, out_p) multiples of 128 and append the bias row."""
    fi, fo = w.shape
    fi_p = _round_up(fi, _LANE)
    fo_p = _round_up(fo, _LANE)
    wb = jnp.zeros((fi_p + _BIAS_ROWS, fo_p), jnp.float32)
    wb = wb.at[:fi, :fo].set(w)
    wb = wb.at[fi_p, :fo].set(jnp.reshape(b, (-1,)))
    return wb.astype(mxu_dtype)


@functools.partial(jax.jit, static_argnames=("batch_tile", "mxu_dtype"))
def mlp_forward(x, params, *, batch_tile=None, mxu_dtype=jnp.float32):
    """params = [(W1,b1),...,(W5,b5)] with Wi: [in,out], bi: [1,out] (or [out])."""
    B, n_in = x.shape
    n_out = params[-1][0].shape[1]

    packed = [_pack_layer(w, b, mxu_dtype) for (w, b) in params]
    n_in_p = packed[0].shape[0] - _BIAS_ROWS
    n_out_p = packed[-1].shape[1]

    # Big batch tiles: few grid steps and full MXU row utilization.
    if batch_tile is None:
        batch_tile = min(256, _round_up(B, _SUBLANE))
    batch_tile = _round_up(batch_tile, _SUBLANE)
    grid_b = pl.cdiv(B, batch_tile)
    b_p = grid_b * batch_tile

    # Pad batch rows and input features with zeros; sliced off after the call.
    x_p = jnp.zeros((b_p, n_in_p), jnp.float32).at[:B, :n_in].set(x)

    in_specs = [pl.BlockSpec((batch_tile, n_in_p), lambda i: (i, 0))]
    for wb in packed:
        # Constant block index -> the packed weights stay resident in VMEM
        # across all batch tiles (no per-step re-streaming).
        in_specs.append(pl.BlockSpec(wb.shape, lambda i: (0, 0)))
    out_spec = pl.BlockSpec((batch_tile, n_out_p), lambda i: (i, 0))

    flops = 0
    bytes_accessed = x_p.size * x_p.dtype.itemsize + b_p * n_out_p * 4
    for wb in packed:
        d_in = wb.shape[0] - _BIAS_ROWS
        d_out = wb.shape[1]
        flops += 2 * b_p * d_in * d_out
        bytes_accessed += wb.size * wb.dtype.itemsize

    out = pl.pallas_call(
        functools.partial(mlp_kernel, mxu_dtype=mxu_dtype),
        out_shape=jax.ShapeDtypeStruct((b_p, n_out_p), jnp.float32),
        grid_spec=pltpu.PrefetchScalarGridSpec(
            num_scalar_prefetch=0,
            grid=(grid_b,),
            in_specs=in_specs,
            out_specs=out_spec,
        ),
        compiler_params=pltpu.CompilerParams(
            dimension_semantics=("parallel",),
        ),
        cost_estimate=pl.CostEstimate(
            flops=int(flops), transcendentals=0,
            bytes_accessed=int(bytes_accessed)),
    )(x_p, *packed)
    return out[:B, :n_out]


def init_params(key, n_input, n_hidden, n_output):
    """Deterministic init mimicking nn.Linear shapes (weights stored [in,out])."""
    dims = [(n_input, n_hidden), (n_hidden, n_hidden), (n_hidden, n_hidden),
            (n_hidden, n_hidden), (n_hidden, n_output)]
    params = []
    for (fan_in, fan_out) in dims:
        key, kw, kb = jax.random.split(key, 3)
        bound = 1.0 / jnp.sqrt(fan_in)
        w = jax.random.uniform(kw, (fan_in, fan_out), jnp.float32, -bound, bound)
        b = jax.random.uniform(kb, (1, fan_out), jnp.float32, -bound, bound)
        params.append((w, b))
    return params


def reference_forward(x, params):
    h = x
    for i, (w, b) in enumerate(params):
        h = h @ w + b
        if i != len(params) - 1:
            h = jnp.maximum(h, 0.0)
    return h


if __name__ == "__main__":
    n_input, n_hidden, n_output = 16, 32, 8
    batch = 16

    key = jax.random.PRNGKey(0)
    key, kx = jax.random.split(key)
    x = jax.random.normal(kx, (batch, n_input), jnp.float32)
    params = init_params(key, n_input, n_hidden, n_output)

    ref = reference_forward(x, params)

    # Default f32 path (safe on all generations).
    out = jax.block_until_ready(mlp_forward(x, params))
    assert out.shape == (batch, n_output)
    assert jnp.allclose(out, ref, atol=1e-4, rtol=1e-4)

    # bf16 MXU-operand path (v6e/v7x recommendation), f32 accumulation.
    out_bf16 = jax.block_until_ready(
        mlp_forward(x, params, mxu_dtype=jnp.bfloat16))
    assert jnp.allclose(out_bf16, ref, atol=5e-2, rtol=5e-2)

    print("KERNEL_OK")
</pallas_src>

<mosaic_0001>
module attributes {stable_mosaic.version = 11 : i64} {
  func.func @mlp_kernel(%arg0: i32, %arg1: memref<16x128xf32, #tpu.memory_space<vmem>>, %arg2: memref<136x128xf32, #tpu.memory_space<vmem>>, %arg3: memref<136x128xf32, #tpu.memory_space<vmem>>, %arg4: memref<136x128xf32, #tpu.memory_space<vmem>>, %arg5: memref<136x128xf32, #tpu.memory_space<vmem>>, %arg6: memref<136x128xf32, #tpu.memory_space<vmem>>, %arg7: memref<16x128xf32, #tpu.memory_space<vmem>>) attributes {dimension_semantics = [#tpu.dimension_semantics<parallel>], iteration_bounds = array<i64: 1>, scalar_prefetch = 0 : i64, scratch_operands = 0 : i64, tpu.core_type = #tpu.core_type<tc>, window_params = [{transform_indices = @transform_0, window_bounds = array<i64: 16, 128>}, {pipeline_mode = #tpu.pipeline_mode<synchronous>, transform_indices = @transform_1, window_bounds = array<i64: 136, 128>}, {pipeline_mode = #tpu.pipeline_mode<synchronous>, transform_indices = @transform_2, window_bounds = array<i64: 136, 128>}, {pipeline_mode = #tpu.pipeline_mode<synchronous>, transform_indices = @transform_3, window_bounds = array<i64: 136, 128>}, {pipeline_mode = #tpu.pipeline_mode<synchronous>, transform_indices = @transform_4, window_bounds = array<i64: 136, 128>}, {pipeline_mode = #tpu.pipeline_mode<synchronous>, transform_indices = @transform_5, window_bounds = array<i64: 136, 128>}, {transform_indices = @transform_6, window_bounds = array<i64: 16, 128>}]} {
    %c0 = arith.constant 0 : index
    %c0_0 = arith.constant 0 : index
    %0 = vector.load %arg1[%c0, %c0_0] : memref<16x128xf32, #tpu.memory_space<vmem>>, vector<16x128xf32>
    %c0_1 = arith.constant 0 : index
    %c0_2 = arith.constant 0 : index
    %1 = vector.load %arg2[%c0_1, %c0_2] : memref<136x128xf32, #tpu.memory_space<vmem>>, vector<128x128xf32>
    %c128 = arith.constant 128 : index
    %c0_3 = arith.constant 0 : index
    %2 = vector.load %arg2[%c128, %c0_3] : memref<136x128xf32, #tpu.memory_space<vmem>>, vector<1x128xf32>
    %cst = arith.constant dense<0.000000e+00> : vector<16x128xf32>
    %3 = tpu.matmul %0, %1, %cst {dimension_numbers = #tpu.dot_dimension_numbers<[1], [0], [0], [1], [0, 0, 1, 1], [], []>} : vector<16x128xf32>, vector<128x128xf32>, vector<16x128xf32> -> vector<16x128xf32>
    %4 = vector.broadcast %2 : vector<1x128xf32> to vector<16x128xf32>
    %5 = arith.addf %3, %4 : vector<16x128xf32>
    %cst_4 = arith.constant 0.000000e+00 : f32
    %6 = vector.broadcast %cst_4 : f32 to vector<16x128xf32>
    %7 = arith.maximumf %5, %6 : vector<16x128xf32>
    %c0_5 = arith.constant 0 : index
    %c0_6 = arith.constant 0 : index
    %8 = vector.load %arg3[%c0_5, %c0_6] : memref<136x128xf32, #tpu.memory_space<vmem>>, vector<128x128xf32>
    %c128_7 = arith.constant 128 : index
    %c0_8 = arith.constant 0 : index
    %9 = vector.load %arg3[%c128_7, %c0_8] : memref<136x128xf32, #tpu.memory_space<vmem>>, vector<1x128xf32>
    %cst_9 = arith.constant dense<0.000000e+00> : vector<16x128xf32>
    %10 = tpu.matmul %7, %8, %cst_9 {dimension_numbers = #tpu.dot_dimension_numbers<[1], [0], [0], [1], [0, 0, 1, 1], [], []>} : vector<16x128xf32>, vector<128x128xf32>, vector<16x128xf32> -> vector<16x128xf32>
    %11 = vector.broadcast %9 : vector<1x128xf32> to vector<16x128xf32>
    %12 = arith.addf %10, %11 : vector<16x128xf32>
    %cst_10 = arith.constant 0.000000e+00 : f32
    %13 = vector.broadcast %cst_10 : f32 to vector<16x128xf32>
    %14 = arith.maximumf %12, %13 : vector<16x128xf32>
    %c0_11 = arith.constant 0 : index
    %c0_12 = arith.constant 0 : index
    %15 = vector.load %arg4[%c0_11, %c0_12] : memref<136x128xf32, #tpu.memory_space<vmem>>, vector<128x128xf32>
    %c128_13 = arith.constant 128 : index
    %c0_14 = arith.constant 0 : index
    %16 = vector.load %arg4[%c128_13, %c0_14] : memref<136x128xf32, #tpu.memory_space<vmem>>, vector<1x128xf32>
    %cst_15 = arith.constant dense<0.000000e+00> : vector<16x128xf32>
    %17 = tpu.matmul %14, %15, %cst_15 {dimension_numbers = #tpu.dot_dimension_numbers<[1], [0], [0], [1], [0, 0, 1, 1], [], []>} : vector<16x128xf32>, vector<128x128xf32>, vector<16x128xf32> -> vector<16x128xf32>
    %18 = vector.broadcast %16 : vector<1x128xf32> to vector<16x128xf32>
    %19 = arith.addf %17, %18 : vector<16x128xf32>
    %cst_16 = arith.constant 0.000000e+00 : f32
    %20 = vector.broadcast %cst_16 : f32 to vector<16x128xf32>
    %21 = arith.maximumf %19, %20 : vector<16x128xf32>
    %c0_17 = arith.constant 0 : index
    %c0_18 = arith.constant 0 : index
    %22 = vector.load %arg5[%c0_17, %c0_18] : memref<136x128xf32, #tpu.memory_space<vmem>>, vector<128x128xf32>
    %c128_19 = arith.constant 128 : index
    %c0_20 = arith.constant 0 : index
    %23 = vector.load %arg5[%c128_19, %c0_20] : memref<136x128xf32, #tpu.memory_space<vmem>>, vector<1x128xf32>
    %cst_21 = arith.constant dense<0.000000e+00> : vector<16x128xf32>
    %24 = tpu.matmul %21, %22, %cst_21 {dimension_numbers = #tpu.dot_dimension_numbers<[1], [0], [0], [1], [0, 0, 1, 1], [], []>} : vector<16x128xf32>, vector<128x128xf32>, vector<16x128xf32> -> vector<16x128xf32>
    %25 = vector.broadcast %23 : vector<1x128xf32> to vector<16x128xf32>
    %26 = arith.addf %24, %25 : vector<16x128xf32>
    %cst_22 = arith.constant 0.000000e+00 : f32
    %27 = vector.broadcast %cst_22 : f32 to vector<16x128xf32>
    %28 = arith.maximumf %26, %27 : vector<16x128xf32>
    %c0_23 = arith.constant 0 : index
    %c0_24 = arith.constant 0 : index
    %29 = vector.load %arg6[%c0_23, %c0_24] : memref<136x128xf32, #tpu.memory_space<vmem>>, vector<128x128xf32>
    %c128_25 = arith.constant 128 : index
    %c0_26 = arith.constant 0 : index
    %30 = vector.load %arg6[%c128_25, %c0_26] : memref<136x128xf32, #tpu.memory_space<vmem>>, vector<1x128xf32>
    %cst_27 = arith.constant dense<0.000000e+00> : vector<16x128xf32>
    %31 = tpu.matmul %28, %29, %cst_27 {dimension_numbers = #tpu.dot_dimension_numbers<[1], [0], [0], [1], [0, 0, 1, 1], [], []>} : vector<16x128xf32>, vector<128x128xf32>, vector<16x128xf32> -> vector<16x128xf32>
    %32 = vector.broadcast %30 : vector<1x128xf32> to vector<16x128xf32>
    %33 = arith.addf %31, %32 : vector<16x128xf32>
    %c0_28 = arith.constant 0 : index
    %c0_29 = arith.constant 0 : index
    %34 = vector.load %arg7[%c0_28, %c0_29] : memref<16x128xf32, #tpu.memory_space<vmem>>, vector<16x128xf32>
    tpu.vector_store %arg7[%c0_28, %c0_29], %33 {strides = array<i32>} : memref<16x128xf32, #tpu.memory_space<vmem>>, vector<16x128xf32>,
    return
  }
  func.func @transform_0(%arg0: i32) -> (i32, i32) {
    %c0_i32 = arith.constant 0 : i32
    %c0_i32_0 = arith.constant 0 : i32
    return %arg0, %c0_i32 : i32, i32
  }
  func.func @transform_1(%arg0: i32) -> (i32, i32) {
    %c0_i32 = arith.constant 0 : i32
    %c0_i32_0 = arith.constant 0 : i32
    %c0_i32_1 = arith.constant 0 : i32
    return %c0_i32, %c0_i32_0 : i32, i32
  }
  func.func @transform_2(%arg0: i32) -> (i32, i32) {
    %c0_i32 = arith.constant 0 : i32
    %c0_i32_0 = arith.constant 0 : i32
    %c0_i32_1 = arith.constant 0 : i32
    return %c0_i32, %c0_i32_0 : i32, i32
  }
  func.func @transform_3(%arg0: i32) -> (i32, i32) {
    %c0_i32 = arith.constant 0 : i32
    %c0_i32_0 = arith.constant 0 : i32
    %c0_i32_1 = arith.constant 0 : i32
    return %c0_i32, %c0_i32_0 : i32, i32
  }
  func.func @transform_4(%arg0: i32) -> (i32, i32) {
    %c0_i32 = arith.constant 0 : i32
    %c0_i32_0 = arith.constant 0 : i32
    %c0_i32_1 = arith.constant 0 : i32
    return %c0_i32, %c0_i32_0 : i32, i32
  }
  func.func @transform_5(%arg0: i32) -> (i32, i32) {
    %c0_i32 = arith.constant 0 : i32
    %c0_i32_0 = arith.constant 0 : i32
    %c0_i32_1 = arith.constant 0 : i32
    return %c0_i32, %c0_i32_0 : i32, i32
  }
  func.func @transform_6(%arg0: i32) -> (i32, i32) {
    %c0_i32 = arith.constant 0 : i32
    %c0_i32_0 = arith.constant 0 : i32
    return %arg0, %c0_i32 : i32, i32
  }
}

</mosaic_0001>

<bundles_post_ra>
// kernel: mlp_forward.1
= control target key start
LH: loop header
LB: loop body
LE: loop exit
PB: predicated region body
PF: predicated region fallthrough
CT: control target
= control target key end

     0   :  { %s1251_s1 = inlined_call_operand.vmem [shape: f32[136,128], index: 1, kind: input, shape index: {}]   ;;  %s1252_s0 = inlined_call_operand.vmem [shape: f32[16,128], index: 0, kind: input, shape index: {}]   ;;  %s1253_s2 = inlined_call_operand.vmem [shape: f32[136,128], index: 2, kind: input, shape index: {}]   ;;  %s1254_s3 = inlined_call_operand.vmem [shape: f32[136,128], index: 3, kind: input, shape index: {}]   ;;  %s1255_s4 = inlined_call_operand.vmem [shape: f32[136,128], index: 4, kind: input, shape index: {}]   ;;  %s1256_s5 = inlined_call_operand.vmem [shape: f32[136,128], index: 5, kind: input, shape index: {}]   ;;  %s1257_s6 = inlined_call_operand.vmem [shape: f32[16,128], index: 6, kind: output, shape index: {}]  }
   0x1   :  { %v25_v0 = vld [vmem:[%s1251_s1] sm:$0xff]  ;;  %v26_v1 = vld [vmem:[%s1251_s1 + $0x8] sm:$0xff]  ;;  %v27_v2 = vld [vmem:[%s1251_s1 + $0x10] sm:$0xff] }
   0x2   :  { %v789_v3 = vpack.c.bf16 %v26_v1, %v25_v0  ;;  %v28_v4 = vld [vmem:[%s1251_s1 + $0x18] sm:$0xff]  ;;  %v29_v6 = vld [vmem:[%s1251_s1 + $0x20] sm:$0xff]  ;;  %v30_v7 = vld [vmem:[%s1251_s1 + $0x28] sm:$0xff] }
   0x3   :  { %v793_v5 = vpack.c.bf16 %v28_v4, %v27_v2  ;;  %v797_v8 = vpack.c.bf16 %v30_v7, %v29_v6  ;;  %v31_v9 = vld [vmem:[%s1251_s1 + $0x30] sm:$0xff]  ;;  %v32_v10 = vld [vmem:[%s1251_s1 + $0x38] sm:$0xff]  ;;  %v23_v11 = vld [vmem:[%s1252_s0] sm:$0xff] }
   0x4   :  { %790 = vmatprep.subr.bf16.mxu0 %v789_v3  ;;  %646 = vmatprep.mubr.f32.mxu0 %v23_v11  ;;  %v123_v12 = vld [vmem:[%s1253_s2] sm:$0xff]  ;;  %v124_v13 = vld [vmem:[%s1253_s2 + $0x8] sm:$0xff]  ;;  %v125_v14 = vld [vmem:[%s1253_s2 + $0x10] sm:$0xff]  ;;  %v801_v20 = vpack.c.bf16 %v32_v10, %v31_v9 }
   0x5   :  { %792 = vmatpush3.bf16.msra.mxu0 %v789_v3  ;;  %v821_v15 = vpack.c.bf16 %v124_v13, %v123_v12  ;;  %v126_v16 = vld [vmem:[%s1253_s2 + $0x18] sm:$0xff]  ;;  %v127_v18 = vld [vmem:[%s1253_s2 + $0x20] sm:$0xff]  ;;  %v128_v19 = vld [vmem:[%s1253_s2 + $0x28] sm:$0xff] }
   0x6   :  { %794 = vmatprep.subr.bf16.mxu0 %v793_v5  ;;  %v825_v17 = vpack.c.bf16 %v126_v16, %v125_v14  ;;  %v33_v21 = vld [vmem:[%s1251_s1 + $0x40] sm:$0xff]  ;;  %v34_v22 = vld [vmem:[%s1251_s1 + $0x48] sm:$0xff]  ;;  %v829_v23 = vpack.c.bf16 %v128_v19, %v127_v18  ;;  %v129_v24 = vld [vmem:[%s1253_s2 + $0x30] sm:$0xff] }
   0x7   :  { %822 = vmatprep.subr.bf16.mxu1 %v821_v15  ;;  %v130_v25 = vld [vmem:[%s1253_s2 + $0x38] sm:$0xff]  ;;  %v805_v26 = vpack.c.bf16 %v34_v22, %v33_v21  ;;  %v35_v27 = vld [vmem:[%s1251_s1 + $0x50] sm:$0xff]  ;;  %v131_v30 = vld [vmem:[%s1253_s2 + $0x40] sm:$0xff] }
   0x8   :  { %824 = vmatpush3.bf16.msra.mxu1 %v821_v15  ;;  %v36_v28 = vld [vmem:[%s1251_s1 + $0x58] sm:$0xff]  ;;  %v833_v29 = vpack.c.bf16 %v130_v25, %v129_v24  ;;  %v132_v31 = vld [vmem:[%s1253_s2 + $0x48] sm:$0xff]  ;;  %v37_v33 = vld [vmem:[%s1251_s1 + $0x60] sm:$0xff] }
   0x9   :  { %796 = vmatpush3.bf16.msra.mxu0 %v793_v5  ;;  %826 = vmatprep.subr.bf16.mxu1 %v825_v17  ;;  %v809_v32 = vpack.c.bf16 %v36_v28, %v35_v27  ;;  %v38_v34 = vld [vmem:[%s1251_s1 + $0x68] sm:$0xff]  ;;  %v837_v35 = vpack.c.bf16 %v132_v31, %v131_v30  ;;  %v133_v36 = vld [vmem:[%s1253_s2 + $0x50] sm:$0xff]  ;;  %v134_v37 = vld [vmem:[%s1253_s2 + $0x58] sm:$0xff] }
   0xa   :  { %798 = vmatprep.subr.bf16.mxu0 %v797_v8  ;;  %v813_v38 = vpack.c.bf16 %v38_v34, %v37_v33  ;;  %v39_v39 = vld [vmem:[%s1251_s1 + $0x70] sm:$0xff]  ;;  %v40_v40 = vld [vmem:[%s1251_s1 + $0x78] sm:$0xff]  ;;  %v841_v41 = vpack.c.bf16 %v134_v37, %v133_v36  ;;  %v135_v42 = vld [vmem:[%s1253_s2 + $0x60] sm:$0xff] }
   0xb   :  { %v136_v43 = vld [vmem:[%s1253_s2 + $0x68] sm:$0xff]  ;;  %v817_v44 = vpack.c.bf16 %v40_v40, %v39_v39  ;;  %v137_v47 = vld [vmem:[%s1253_s2 + $0x70] sm:$0xff]  ;;  %v138_v48 = vld [vmem:[%s1253_s2 + $0x78] sm:$0xff] }
   0xc   :  { %828 = vmatpush3.bf16.msra.mxu1 %v825_v17  ;;  %v845_v45 = vpack.c.bf16 %v136_v43, %v135_v42  ;;  %v24_v46 = vld [vmem:[%s1252_s0 + $0x8] sm:$0xff]  ;;  %v849_v49 = vpack.c.bf16 %v138_v48, %v137_v47  ;;  %v221_v50 = vld [vmem:[%s1254_s3] sm:$0xff]  ;;  %v223_v52 = vld [vmem:[%s1254_s3 + $0x10] sm:$0xff] }
   0xd   :  { %800 = vmatpush3.bf16.msra.mxu0 %v797_v8  ;;  %830 = vmatprep.subr.bf16.mxu1 %v829_v23  ;;  %v222_v51 = vld [vmem:[%s1254_s3 + $0x8] sm:$0xff]  ;;  %v224_v54 = vld [vmem:[%s1254_s3 + $0x18] sm:$0xff]  ;;  %v225_v56 = vld [vmem:[%s1254_s3 + $0x20] sm:$0xff] }
   0xe   :  { %802 = vmatprep.subr.bf16.mxu0 %v801_v20  ;;  %v853_v53 = vpack.c.bf16 %v222_v51, %v221_v50  ;;  %v857_v55 = vpack.c.bf16 %v224_v54, %v223_v52  ;;  %v226_v57 = vld [vmem:[%s1254_s3 + $0x28] sm:$0xff]  ;;  %v227_v59 = vld [vmem:[%s1254_s3 + $0x30] sm:$0xff]  ;;  %v228_v60 = vld [vmem:[%s1254_s3 + $0x38] sm:$0xff] }
   0xf   :  { %v861_v58 = vpack.c.bf16 %v226_v57, %v225_v56  ;;  %v865_v61 = vpack.c.bf16 %v228_v60, %v227_v59  ;;  %v229_v62 = vld [vmem:[%s1254_s3 + $0x40] sm:$0xff]  ;;  %v230_v63 = vld [vmem:[%s1254_s3 + $0x48] sm:$0xff]  ;;  %v231_v1 = vld [vmem:[%s1254_s3 + $0x50] sm:$0xff] }
  0x10   :  { %832 = vmatpush3.bf16.msra.mxu1 %v829_v23  ;;  %v869_v0 = vpack.c.bf16 %v230_v63, %v229_v62  ;;  %v232_v2 = vld [vmem:[%s1254_s3 + $0x58] sm:$0xff]  ;;  %v233_v4 = vld [vmem:[%s1254_s3 + $0x60] sm:$0xff]  ;;  %v234_v5 = vld [vmem:[%s1254_s3 + $0x68] sm:$0xff] }
  0x11   :  { %804 = vmatpush3.bf16.msra.mxu0 %v801_v20  ;;  %834 = vmatprep.subr.bf16.mxu1 %v833_v29  ;;  %v873_v3 = vpack.c.bf16 %v232_v2, %v231_v1  ;;  %v877_v6 = vpack.c.bf16 %v234_v5, %v233_v4  ;;  %v519_v7 = vld [vmem:[%s1251_s1 + $0x80] ss:$0 sm:$0xff]  ;;  %v235_v14 = vld [vmem:[%s1254_s3 + $0x70] sm:$0xff]  ;;  %v236_v15 = vld [vmem:[%s1254_s3 + $0x78] sm:$0xff] }
  0x12   :  { %806 = vmatprep.subr.bf16.mxu0 %v805_v26  ;;  %v881_v16 = vpack.c.bf16 %v236_v15, %v235_v14  ;;  %v319_v17 = vld [vmem:[%s1255_s4] sm:$0xff]  ;;  %v320_v18 = vld [vmem:[%s1255_s4 + $0x8] sm:$0xff]  ;;  %v321_v19 = vld [vmem:[%s1255_s4 + $0x10] sm:$0xff] }
  0x13   :  { %v885_v20 = vpack.c.bf16 %v320_v18, %v319_v17  ;;  %v322_v21 = vld [vmem:[%s1255_s4 + $0x18] sm:$0xff]  ;;  %v323_v23 = vld [vmem:[%s1255_s4 + $0x20] sm:$0xff]  ;;  %v324_v24 = vld [vmem:[%s1255_s4 + $0x28] sm:$0xff] }
  0x14   :  { %836 = vmatpush3.bf16.msra.mxu1 %v833_v29  ;;  %v889_v22 = vpack.c.bf16 %v322_v21, %v321_v19  ;;  %v893_v25 = vpack.c.bf16 %v324_v24, %v323_v23  ;;  %v326_v27 = vld [vmem:[%s1255_s4 + $0x38] sm:$0xff]  ;;  %v327_v29 = vld [vmem:[%s1255_s4 + $0x40] sm:$0xff]  ;;  %v328_v30 = vld [vmem:[%s1255_s4 + $0x48] sm:$0xff] }
  0x15   :  { %808 = vmatpush3.bf16.msra.mxu0 %v805_v26  ;;  %838 = vmatprep.subr.bf16.mxu1 %v837_v35  ;;  %v325_v26 = vld [vmem:[%s1255_s4 + $0x30] sm:$0xff]  ;;  %v901_v31 = vpack.c.bf16 %v328_v30, %v327_v29  ;;  %v330_v33 = vld [vmem:[%s1255_s4 + $0x58] sm:$0xff]  ;;  %v332_v36 = vld [vmem:[%s1255_s4 + $0x68] sm:$0xff] }
  0x16   :  { %810 = vmatprep.subr.bf16.mxu0 %v809_v32  ;;  %v897_v28 = vpack.c.bf16 %v326_v27, %v325_v26  ;;  %v417_v48 = vld [vmem:[%s1256_s5] sm:$0xff]  ;;  %v419_v50 = vld [vmem:[%s1256_s5 + $0x10] sm:$0xff]  ;;  %v420_v52 = vld [vmem:[%s1256_s5 + $0x18] sm:$0xff] }
  0x17   :  { %v421_v54 = vld [vmem:[%s1256_s5 + $0x20] sm:$0xff]  ;;  %v423_v57 = vld [vmem:[%s1256_s5 + $0x30] sm:$0xff] }
  0x18   :  { %840 = vmatpush3.bf16.msra.mxu1 %v837_v35  ;;  %v331_v35 = vld [vmem:[%s1255_s4 + $0x60] sm:$0xff]  ;;  %v427_v63 = vld [vmem:[%s1256_s5 + $0x50] sm:$0xff] }
  0x19   :  { %812 = vmatpush3.bf16.msra.mxu0 %v809_v32  ;;  %842 = vmatprep.subr.bf16.mxu1 %v841_v41  ;;  %v329_v32 = vld [vmem:[%s1255_s4 + $0x50] sm:$0xff]  ;;  %v909_v37 = vpack.c.bf16 %v332_v36, %v331_v35  ;;  %v425_v60 = vld [vmem:[%s1256_s5 + $0x40] sm:$0xff] }
  0x1a   :  { %814 = vmatprep.subr.bf16.mxu0 %v813_v38  ;;  %v905_v34 = vpack.c.bf16 %v330_v33, %v329_v32  ;;  %v429_v2 = vld [vmem:[%s1256_s5 + $0x60] sm:$0xff] }
  0x1b   :  { %v521_v5 = vld [vmem:[%s1254_s3 + $0x80] ss:$0 sm:$0xff] }
  0x1c   :  { %844 = vmatpush3.bf16.msra.mxu1 %v841_v41  ;;  %v522_v15 = vld [vmem:[%s1255_s4 + $0x80] ss:$0 sm:$0xff] }
  0x1d   :  { %816 = vmatpush3.bf16.msra.mxu0 %v813_v38  ;;  %846 = vmatprep.subr.bf16.mxu1 %v845_v45  ;;  %v520_v38 = vld [vmem:[%s1253_s2 + $0x80] ss:$0 sm:$0xff] }
  0x1e   :  { %818 = vmatprep.subr.bf16.mxu0 %v817_v44 }
  0x20   :  { %848 = vmatpush3.bf16.msra.mxu1 %v845_v45  ;;  %v333_v45 = vld [vmem:[%s1255_s4 + $0x70] sm:$0xff] }
  0x21   :  { %820 = vmatpush3.bf16.msra.mxu0 %v817_v44  ;;  %850 = vmatprep.subr.bf16.mxu1 %v849_v49 }
  0x22   :  { %854 = vmatprep.subr.bf16.mxu0 %v853_v53 }
  0x24   :  { %647 = vmatmul.mubr.f32.vlgmr.msra.gmra.mrb[0].mxu0 %v24_v46  ;;  %852 = vmatpush3.bf16.msra.mxu1 %v849_v49  ;;  %v334_v46 = vld [vmem:[%s1255_s4 + $0x78] sm:$0xff]  ;;  %v418_v49 = vld [vmem:[%s1256_s5 + $0x8] sm:$0xff] }
  0x25   :  { %856 = vmatpush3.bf16.msra.mxu0 %v853_v53  ;;  %886 = vmatprep.subr.bf16.mxu1 %v885_v20  ;;  %v913_v47 = vpack.c.bf16 %v334_v46, %v333_v45  ;;  %v917_v51 = vpack.c.bf16 %v418_v49, %v417_v48  ;;  %v921_v53 = vpack.c.bf16 %v420_v52, %v419_v50 }
  0x26   :  { %858 = vmatprep.subr.bf16.mxu0 %v857_v55 }
  0x29   :  { %860 = vmatpush3.bf16.msra.mxu0 %v857_v55  ;;  %v422_v55 = vld [vmem:[%s1256_s5 + $0x28] sm:$0xff] }
  0x2a   :  { %862 = vmatprep.subr.bf16.mxu0 %v861_v58  ;;  %v925_v56 = vpack.c.bf16 %v422_v55, %v421_v54 }
  0x2d   :  { %864 = vmatpush3.bf16.msra.mxu0 %v861_v58  ;;  %v424_v58 = vld [vmem:[%s1256_s5 + $0x38] sm:$0xff] }
  0x2e   :  { %866 = vmatprep.subr.bf16.mxu0 %v865_v61  ;;  %v929_v59 = vpack.c.bf16 %v424_v58, %v423_v57 }
  0x31   :  { %868 = vmatpush3.bf16.msra.mxu0 %v865_v61  ;;  %v426_v61 = vld [vmem:[%s1256_s5 + $0x48] sm:$0xff] }
  0x32   :  { %870 = vmatprep.subr.bf16.mxu0 %v869_v0  ;;  %v933_v62 = vpack.c.bf16 %v426_v61, %v425_v60 }
  0x35   :  { %872 = vmatpush3.bf16.msra.mxu0 %v869_v0  ;;  %v428_v0 = vld [vmem:[%s1256_s5 + $0x58] sm:$0xff] }
  0x36   :  { %874 = vmatprep.subr.bf16.mxu0 %v873_v3  ;;  %v937_v1 = vpack.c.bf16 %v428_v0, %v427_v63 }
  0x39   :  { %876 = vmatpush3.bf16.msra.mxu0 %v873_v3  ;;  %v430_v3 = vld [vmem:[%s1256_s5 + $0x68] sm:$0xff] }
  0x3a   :  { %878 = vmatprep.subr.bf16.mxu0 %v877_v6  ;;  %v941_v4 = vpack.c.bf16 %v430_v3, %v429_v2 }
  0x3d   :  { %880 = vmatpush3.bf16.msra.mxu0 %v877_v6 }
  0x3e   :  { %882 = vmatprep.subr.bf16.mxu0 %v881_v16 }
  0x41   :  { %884 = vmatpush3.bf16.msra.mxu0 %v881_v16 }
  0x42   :  { %918 = vmatprep.subr.bf16.mxu0 %v917_v51 }
  0xf7   :  { %v648_v8 = vpop.f32.mrb[0].mxu0 }
  0xf8   :  { %v118_v9 = vadd.f32 %v648_v8, %v519_v7  ;;  %v112_v10 = vpop.f32.mrb[1].mxu0 }
  0xf9   :  { %v113_v11 = vadd.f32 %v519_v7, %v112_v10 }
  0xfa   :  { %v122_v13 = vmax.f32 %v118_v9, 0.0 }
  0xfb   :  { %v121_v12 = vmax.f32 %v113_v11, 0.0 }
  0xfd   :  { %681 = vmatprep.mubr.f32.mxu1 %v121_v12  ;;  %v431_v12 = vld [vmem:[%s1256_s5 + $0x70] sm:$0xff] }
  0xfe   :  { %682 = vmatmul.mubr.f32.vlgmr.msra.gmra.mrb[0].mxu1 %v122_v13  ;;  %v432_v13 = vld [vmem:[%s1256_s5 + $0x78] sm:$0xff] }
  0xff   :  { %888 = vmatpush3.bf16.msra.mxu1 %v885_v20  ;;  %v945_v14 = vpack.c.bf16 %v432_v13, %v431_v12 }
 0x100   :  { %890 = vmatprep.subr.bf16.mxu1 %v889_v22 }
 0x103   :  { %892 = vmatpush3.bf16.msra.mxu1 %v889_v22  ;;  %v523_v22 = vld [vmem:[%s1256_s5 + $0x80] ss:$0 sm:$0xff] }
 0x104   :  { %894 = vmatprep.subr.bf16.mxu1 %v893_v25 }
 0x107   :  { %896 = vmatpush3.bf16.msra.mxu1 %v893_v25 }
 0x108   :  { %898 = vmatprep.subr.bf16.mxu1 %v897_v28 }
 0x10b   :  { %900 = vmatpush3.bf16.msra.mxu1 %v897_v28 }
 0x10c   :  { %902 = vmatprep.subr.bf16.mxu1 %v901_v31 }
 0x10f   :  { %904 = vmatpush3.bf16.msra.mxu1 %v901_v31 }
 0x110   :  { %906 = vmatprep.subr.bf16.mxu1 %v905_v34 }
 0x113   :  { %908 = vmatpush3.bf16.msra.mxu1 %v905_v34 }
 0x114   :  { %910 = vmatprep.subr.bf16.mxu1 %v909_v37 }
 0x117   :  { %912 = vmatpush3.bf16.msra.mxu1 %v909_v37 }
 0x118   :  { %914 = vmatprep.subr.bf16.mxu1 %v913_v47 }
 0x11b   :  { %916 = vmatpush3.bf16.msra.mxu1 %v913_v47 }
 0x1d1   :  { %v683_v39 = vpop.f32.mrb[0].mxu1 }
 0x1d2   :  { %v216_v40 = vadd.f32 %v683_v39, %v520_v38  ;;  %v210_v41 = vpop.f32.mrb[1].mxu1 }
 0x1d3   :  { %v211_v42 = vadd.f32 %v520_v38, %v210_v41 }
 0x1d4   :  { %v220_v44 = vmax.f32 %v216_v40, 0.0 }
 0x1d5   :  { %v219_v43 = vmax.f32 %v211_v42, 0.0 }
 0x1d7   :  { %716 = vmatprep.mubr.f32.mxu0 %v219_v43 }
 0x1d8   :  { %717 = vmatmul.mubr.f32.vlgmr.msra.gmra.mrb[2].mxu0 %v220_v44 }
 0x1d9   :  { %920 = vmatpush3.bf16.msra.mxu0 %v917_v51 }
 0x1da   :  { %922 = vmatprep.subr.bf16.mxu0 %v921_v53 }
 0x1dd   :  { %924 = vmatpush3.bf16.msra.mxu0 %v921_v53 }
 0x1de   :  { %926 = vmatprep.subr.bf16.mxu0 %v925_v56 }
 0x1e1   :  { %928 = vmatpush3.bf16.msra.mxu0 %v925_v56 }
 0x1e2   :  { %930 = vmatprep.subr.bf16.mxu0 %v929_v59 }
 0x1e5   :  { %932 = vmatpush3.bf16.msra.mxu0 %v929_v59 }
 0x1e6   :  { %934 = vmatprep.subr.bf16.mxu0 %v933_v62 }
 0x1e9   :  { %936 = vmatpush3.bf16.msra.mxu0 %v933_v62 }
 0x1ea   :  { %938 = vmatprep.subr.bf16.mxu0 %v937_v1 }
 0x1ed   :  { %940 = vmatpush3.bf16.msra.mxu0 %v937_v1 }
 0x1ee   :  { %942 = vmatprep.subr.bf16.mxu0 %v941_v4 }
 0x1f1   :  { %944 = vmatpush3.bf16.msra.mxu0 %v941_v4 }
 0x1f2   :  { %946 = vmatprep.subr.bf16.mxu0 %v945_v14 }
 0x1f5   :  { %948 = vmatpush3.bf16.msra.mxu0 %v945_v14 }
 0x2ab   :  { %v718_v6 = vpop.f32.mrb[2].mxu0 }
 0x2ac   :  { %v314_v7 = vadd.f32 %v718_v6, %v521_v5  ;;  %v308_v8 = vpop.f32.mrb[3].mxu0 }
 0x2ad   :  { %v309_v9 = vadd.f32 %v521_v5, %v308_v8 }
 0x2ae   :  { %v318_v11 = vmax.f32 %v314_v7, 0.0 }
 0x2af   :  { %v317_v10 = vmax.f32 %v309_v9, 0.0 }
 0x2b1   :  { %751 = vmatprep.mubr.f32.mxu1 %v317_v10 }
 0x2b2   :  { %752 = vmatmul.mubr.f32.vlgmr.msra.gmra.mrb[2].mxu1 %v318_v11 }
 0x385   :  { %v753_v16 = vpop.f32.mrb[2].mxu1 }
 0x386   :  { %v412_v17 = vadd.f32 %v753_v16, %v522_v15  ;;  %v406_v18 = vpop.f32.mrb[3].mxu1 }
 0x387   :  { %v407_v19 = vadd.f32 %v522_v15, %v406_v18 }
 0x388   :  { %v416_v21 = vmax.f32 %v412_v17, 0.0 }
 0x389   :  { %v415_v20 = vmax.f32 %v407_v19, 0.0 }
 0x38b   :  { %786 = vmatprep.mubr.f32.mxu0 %v415_v20 }
 0x38c   :  { %787 = vmatmul.mubr.f32.vlgmr.msra.gmra.mrb[4].mxu0 %v416_v21 }
 0x45f   :  { %v788_v23 = vpop.f32.mrb[4].mxu0 }
 0x460   :  { %v510_v24 = vadd.f32 %v788_v23, %v523_v22  ;;  %v504_v25 = vpop.f32.mrb[5].mxu0 }
 0x461   :  { %v505_v26 = vadd.f32 %v523_v22, %v504_v25 }
 0x462   :  { %514 = vst [vmem:[%s1257_s6 + $0x8] sm:$0xff] %v510_v24 }
 0x463   :  { %513 = vst [vmem:[%s1257_s6] sm:$0xff] %v505_v26 }

</bundles_post_ra>
